<compile_context>
chip_gen: v7x
topology: tpu7x:2x2x1
jax: 0.10.0
libtpu: 0.0.40
codegen_flags: <defaults>
</compile_context>

<pallas_src>
from functools import partial

import numpy as np
import jax
import jax.numpy as jnp
from jax.experimental import pallas as pl
from jax.experimental.pallas import tpu as pltpu


def _round_up(x, m):
    return ((x + m - 1) // m) * m


def _detect_vmem_limit():
    # Generation-aware scoped-VMEM budget: ~70% of physical VMEM
    # (v5e/v6e: 128 MiB -> ~90 MiB, v7x: 64 MiB -> ~45 MiB). Fallback is safe on every gen.
    try:
        info = pltpu.get_tpu_info()
        for name in ("vmem_capacity_bytes", "vmem_size_bytes", "vmem_bytes"):
            cap = getattr(info, name, None)
            if cap:
                return int(int(cap) * 0.7)
    except Exception:
        pass
    return 48 * 1024 * 1024


_VMEM_LIMIT = _detect_vmem_limit()


def _pick_sim_tile(npad):
    # Largest square output tile that still leaves >= 2 grid steps (v7x has 2 TensorCores;
    # a 1-step 'parallel' grid would idle one of them). Blocks are tiny, VMEM is never the issue.
    for t in (512, 256, 128):
        if npad % t == 0 and (npad // t >= 2 or npad == t == 128):
            return t
    return 128


def _pick_lap_tile(npad, vmem_budget):
    # Row-slab tile for the Laplacian kernel: in + out slabs double-buffered plus ~4 (tm, npad)
    # f32 in-kernel temporaries must fit the scoped-VMEM budget; keep >= 2 steps when possible.
    for tm in (512, 256, 128):
        if npad % tm != 0:
            continue
        if npad // tm < 2 and npad > 128:
            continue
        if (2 * 2 + 4) * tm * npad * 4 > vmem_budget:
            continue
        return tm
    return 128


# ----------------------------------------------------------------------------- kernel 1: cosine sim

def _cos_sim_kernel(xb_ref, xc_ref, s_ref, *, n):
    # xb: (TM, Cp) bf16 pre-normalized rows; xc: (TN, Cp) bf16 pre-normalized rows.
    # Pure MXU tile: S_block = xb @ xc.T with f32 accumulation (no per-step VPU normalization).
    j = pl.program_id(1)
    s = jax.lax.dot_general(xb_ref[...], xc_ref[...],
                            (((1,), (1,)), ((), ())),
                            preferred_element_type=jnp.float32)          # (TM, TN)
    tn = s.shape[1]
    col_g = jax.lax.broadcasted_iota(jnp.int32, s.shape, 1) + j * tn
    # Padded columns -> -1e30 so the downstream per-row top_k threshold ignores them
    # (lets the matrix stay padded all the way to the Laplacian kernel).
    s_ref[...] = jnp.where(col_g < n, s, jnp.float32(-1e30))


@jax.jit
def cosine_similarity_padded(x):
    n, c = x.shape
    npad = _round_up(max(n, 8), 128)
    cpad = _round_up(max(c, 1), 128)
    xf = x.astype(jnp.float32)
    # Hoisted row normalization + bf16 cast: done ONCE here instead of once per grid step.
    xn = xf * jax.lax.rsqrt(jnp.maximum(jnp.sum(xf * xf, axis=1, keepdims=True), 1e-24))
    xp = jnp.zeros((npad, cpad), jnp.bfloat16).at[:n, :c].set(xn.astype(jnp.bfloat16))
    t = _pick_sim_tile(npad)
    s = pl.pallas_call(
        partial(_cos_sim_kernel, n=n),
        out_shape=jax.ShapeDtypeStruct((npad, npad), jnp.float32),
        grid=(npad // t, npad // t),
        in_specs=[pl.BlockSpec((t, cpad), lambda i, j: (i, 0)),
                  pl.BlockSpec((t, cpad), lambda i, j: (j, 0))],
        out_specs=pl.BlockSpec((t, t), lambda i, j: (i, j)),
        compiler_params=pltpu.CompilerParams(
            dimension_semantics=("parallel", "parallel"), vmem_limit_bytes=_VMEM_LIMIT),
    )(xp, xp)
    return s  # stays padded (npad, npad); caller keeps n


# ----------------------------------------------------------------------------- kernel 2: pruning + Laplacian

def _laplacian_kernel(s_ref, thr_r_ref, thr_c_ref, l_ref, *, n):
    # s:     (TM, Np) row slab of the (symmetric) cosine-sim matrix
    # thr_r: (TM, 1)  per-row pruning threshold for these rows
    # thr_c: (1, Np)  pruning thresholds of the column owners (same vector, row layout)
    # Pruning is fused here; P.T rows are reconstructed from S's symmetry -> no transposed
    # operand, no strided column DMA, no XLU transpose, no pruned NxN matrix in HBM.
    i = pl.program_id(0)
    s = s_ref[...]
    thr_r = thr_r_ref[...]
    thr_c = thr_c_ref[...]
    tm, npad = s.shape
    row_g = jax.lax.broadcasted_iota(jnp.int32, (tm, npad), 0) + i * tm
    col_g = jax.lax.broadcasted_iota(jnp.int32, (tm, npad), 1)
    p_r = jnp.where(s >= thr_r, s, 0.0)          # P[rows, :]
    p_c = jnp.where(s >= thr_c, s, 0.0)          # P.T[rows, :]  (S is symmetric)
    m = 0.5 * (p_r + p_c)
    diag = row_g == col_g
    valid = (row_g < n) & (col_g < n)
    m = jnp.where(diag | ~valid, 0.0, m)          # zero diagonal + padded region (no eye temp)
    d = jnp.sum(jnp.abs(m), axis=1, keepdims=True)   # (TM, 1) degrees (abs matches reference)
    l_ref[...] = jnp.where(diag, d, -m)              # L = D - M


@partial(jax.jit, static_argnames=("n", "n_keep"))
def pruned_laplacian_padded(s_pad, *, n, n_keep):
    npad = s_pad.shape[0]
    # O(N*k) per-row threshold; padded columns were written as -1e30 so they never rank.
    top_vals = jax.lax.top_k(s_pad, n_keep)[0]
    thr = top_vals[:, n_keep - 1:n_keep]          # (npad, 1)
    thr_t = thr.reshape(1, npad)                  # (1, npad)
    tm = _pick_lap_tile(npad, _VMEM_LIMIT)
    lap = pl.pallas_call(
        partial(_laplacian_kernel, n=n),
        out_shape=jax.ShapeDtypeStruct((npad, npad), jnp.float32),
        grid=(npad // tm,),
        in_specs=[pl.BlockSpec((tm, npad), lambda i: (i, 0)),
                  pl.BlockSpec((tm, 1), lambda i: (i, 0)),
                  pl.BlockSpec((1, npad), lambda i: (0, 0))],
        out_specs=pl.BlockSpec((tm, npad), lambda i: (i, 0)),
        compiler_params=pltpu.CompilerParams(
            dimension_semantics=("parallel",), vmem_limit_bytes=_VMEM_LIMIT),
    )(s_pad, thr, thr_t)
    return lap  # padded; sliced once by the caller right before eigh


# ----------------------------------------------------------------------------- kernel 3: fused k-means

@partial(jax.jit, static_argnames=("n_iter",))
def kmeans_labels(emb, init_centers, *, n_iter=25):
    n, d = emb.shape
    k = init_centers.shape[0]
    npad = _round_up(max(n, 8), 128)   # samples on lanes -> lane-dense label store
    dpad = _round_up(max(d, 1), 128)
    kpad = _round_up(max(k, 1), 8)
    # Embeddings fed as bf16 (halves dominant DMA + VMEM residency); centers stay f32.
    ep = jnp.zeros((npad, dpad), jnp.bfloat16).at[:n, :d].set(emb.astype(jnp.bfloat16))
    cp = jnp.zeros((kpad, dpad), jnp.float32).at[:k, :d].set(init_centers.astype(jnp.float32))
    # Padded CENTER ROWS get a huge coordinate so they never win an assignment
    # (replaces the full (Kp, Np) pad-penalty tensor of the previous version).
    cp = cp.at[k:, :].set(1e6)

    def kernel(e_ref, c_ref, lab_ref):
        e_bf = e_ref[...]                       # (Np, Dp) bf16, resident for all iterations
        c0 = c_ref[...]                         # (Kp, Dp) f32 initial centroids

        row_k = jax.lax.broadcasted_iota(jnp.int32, (kpad, npad), 0)   # cluster id per sublane
        col_n = jax.lax.broadcasted_iota(jnp.int32, (1, npad), 1)      # sample id per lane
        valid = col_n < n                                              # (1, Np) sample mask

        def assign(c):
            # distances in transposed layout (Kp, Np): K on sublanes, N lane-dense.
            ect = jax.lax.dot_general(c.astype(jnp.bfloat16), e_bf,
                                      (((1,), (1,)), ((), ())),
                                      preferred_element_type=jnp.float32)     # (Kp, Np)
            c2 = jnp.sum(c * c, axis=1, keepdims=True)                        # (Kp, 1) via XLU
            dist = c2 - 2.0 * ect                      # ||e||^2 constant per sample -> dropped
            mind = jnp.min(dist, axis=0, keepdims=True)                       # (1, Np)
            return jnp.min(jnp.where(dist == mind, row_k, kpad),
                           axis=0, keepdims=True)                             # (1, Np)

        def body(_, carry):
            c, _old = carry
            lab = assign(c)
            onehot = jnp.where(valid, (row_k == lab).astype(jnp.float32), 0.0)  # (Kp, Np)
            counts = jnp.sum(onehot, axis=1, keepdims=True)                     # (Kp, 1)
            sums = jax.lax.dot_general(onehot.astype(jnp.bfloat16), e_bf,
                                       (((1,), (0,)), ((), ())),
                                       preferred_element_type=jnp.float32)      # (Kp, Dp)
            new_c = jnp.where(counts > 0.0, sums / jnp.maximum(counts, 1.0), c)
            return new_c, lab

        lab0 = jnp.zeros((1, npad), jnp.int32)
        _, lab = jax.lax.fori_loop(0, n_iter, body, (c0, lab0))
        lab_ref[...] = lab                                                      # lane-dense store

    # Gridless pallas_call: whole operands placed once in VMEM (no pipeline double-buffering
    # of grid-invariant inputs).
    labels = pl.pallas_call(
        kernel,
        out_shape=jax.ShapeDtypeStruct((1, npad), jnp.int32),
        compiler_params=pltpu.CompilerParams(vmem_limit_bytes=_VMEM_LIMIT),
    )(ep, cp)
    return labels[0, :n]


# ----------------------------------------------------------------------------- spectral cluster

class SpectralCluster:
    def __init__(self, min_num_spks=1, max_num_spks=15, pval=0.022):
        self.min_num_spks = min_num_spks
        self.max_num_spks = max_num_spks
        self.pval = pval

    def __call__(self, X, oracle_num=None):
        X = jnp.asarray(X)
        n = int(X.shape[0])
        s_pad = cosine_similarity_padded(X)                  # Pallas kernel 1 (stays padded)
        pval = self.pval
        if n * pval < 6:
            pval = 6.0 / n
        n_elems = int((1 - pval) * n)
        n_keep = max(n - n_elems, 1)                         # keep top n_keep entries per row
        # Exact ties at the threshold are kept (reference argsort drops one arbitrarily);
        # vanishingly rare for float cosine similarities.
        lap_pad = pruned_laplacian_padded(s_pad, n=n, n_keep=n_keep)   # Pallas kernel 2
        lap = lap_pad[:n, :n]                                # single slice before eigh
        emb, num_of_spk = self._get_spec_embs(lap, oracle_num)
        labels = self._cluster_embs(emb, num_of_spk)         # Pallas kernel 3 (fused Lloyd)
        return labels

    def _get_spec_embs(self, L, k_oracle=None):
        # TODO(synk): dense symmetric eigendecomposition has no Pallas equivalent; use XLA eigh.
        lambdas, eig_vecs = jnp.linalg.eigh(L)
        lam = np.asarray(lambdas)
        if k_oracle is not None:
            num_of_spk = int(k_oracle)
        else:
            sub = lam[self.min_num_spks - 1:self.max_num_spks + 1]
            gaps = np.diff(sub)
            num_of_spk = int(np.argmax(gaps)) + self.min_num_spks
        emb = jnp.asarray(eig_vecs)[:, :num_of_spk]
        return emb, num_of_spk

    def _cluster_embs(self, emb, k, n_iter=25):
        emb_np = np.asarray(emb)
        n = emb_np.shape[0]
        # deterministic init: evenly spaced rows as initial centroids
        init_idx = np.round(np.linspace(0, n - 1, int(k))).astype(np.int32)
        init_centers = jnp.asarray(emb_np[init_idx])
        labels = kmeans_labels(jnp.asarray(emb_np), init_centers, n_iter=n_iter)
        return np.asarray(labels).reshape(-1)


# ----------------------------------------------------------------------------- backend

class ClusterBackend:
    def __init__(self):
        self.model_config = {'merge_thr': 0.78}
        self.spectral_cluster = SpectralCluster()

    def forward(self, X, **params):
        k = params['oracle_num'] if 'oracle_num' in params else None
        assert X.ndim == 2, 'the shape of input should be [N, C]'
        if X.shape[0] < 20:
            return np.zeros(X.shape[0], dtype='int')
        if X.shape[0] < 2048 or k is not None:
            labels = self.spectral_cluster(X, k)
        else:
            # TODO(synk): UMAP + HDBSCAN path has no Pallas/JAX equivalent (graph/density algorithms).
            labels = self.spectral_cluster(X, k)
        if k is None and 'merge_thr' in self.model_config:
            labels = self.merge_by_cos(labels, np.asarray(X), self.model_config['merge_thr'])
        return labels

    __call__ = forward

    def merge_by_cos(self, labels, embs, cos_thr):
        # host-side post-processing (data-dependent while-loop; tiny matrices)
        assert 0 < cos_thr <= 1
        labels = np.asarray(labels).astype(np.int64).copy()
        # compact label ids (guards against empty k-means clusters)
        uniq = np.unique(labels)
        remap = {int(u): i for i, u in enumerate(uniq)}
        labels = np.array([remap[int(l)] for l in labels], dtype=np.int64)
        while True:
            spk_num = labels.max() + 1
            if spk_num == 1:
                break
            spk_center = []
            for i in range(spk_num):
                spk_center.append(embs[labels == i].mean(0))
            spk_center = np.stack(spk_center, axis=0)
            norm_spk_center = spk_center / np.linalg.norm(spk_center, axis=1, keepdims=True)
            affinity = np.matmul(norm_spk_center, norm_spk_center.T)
            affinity = np.triu(affinity, 1)
            spks = np.unravel_index(np.argmax(affinity), affinity.shape)
            if affinity[spks] < cos_thr:
                break
            for i in range(len(labels)):
                if labels[i] == spks[1]:
                    labels[i] = spks[0]
                elif labels[i] > spks[1]:
                    labels[i] -= 1
        return labels


# ----------------------------------------------------------------------------- main

if __name__ == "__main__":
    key = jax.random.PRNGKey(0)
    N, C, TRUE_K = 32, 128, 3
    k_centers, k_noise = jax.random.split(key)
    centers = jax.random.normal(k_centers, (TRUE_K, C), dtype=jnp.float32) * 3.0
    assign = jnp.arange(N) % TRUE_K
    X = centers[assign] + 0.3 * jax.random.normal(k_noise, (N, C), dtype=jnp.float32)

    backend = ClusterBackend()
    labels = backend(X)

    jax.block_until_ready(jnp.asarray(labels))
    assert labels.shape == (N,)
    print("KERNEL_OK")
</pallas_src>

<mosaic_0001>
module attributes {stable_mosaic.version = 11 : i64} {
  func.func @_cos_sim_kernel(%arg0: i32, %arg1: i32, %arg2: memref<128x128xbf16, #tpu.memory_space<vmem>>, %arg3: memref<128x128xbf16, #tpu.memory_space<vmem>>, %arg4: memref<128x128xf32, #tpu.memory_space<vmem>>) attributes {dimension_semantics = [#tpu.dimension_semantics<parallel>, #tpu.dimension_semantics<parallel>], iteration_bounds = array<i64: 1, 1>, scalar_prefetch = 0 : i64, scratch_operands = 0 : i64, tpu.core_type = #tpu.core_type<tc>, window_params = [{transform_indices = @transform_0, window_bounds = array<i64: 128, 128>}, {transform_indices = @transform_1, window_bounds = array<i64: 128, 128>}, {transform_indices = @transform_2, window_bounds = array<i64: 128, 128>}]} {
    %c0 = arith.constant 0 : index
    %c0_0 = arith.constant 0 : index
    %0 = vector.load %arg2[%c0, %c0_0] : memref<128x128xbf16, #tpu.memory_space<vmem>>, vector<128x128xbf16>
    %c0_1 = arith.constant 0 : index
    %c0_2 = arith.constant 0 : index
    %1 = vector.load %arg3[%c0_1, %c0_2] : memref<128x128xbf16, #tpu.memory_space<vmem>>, vector<128x128xbf16>
    %cst = arith.constant dense<0.000000e+00> : vector<128x128xf32>
    %2 = tpu.matmul %0, %1, %cst {dimension_numbers = #tpu.dot_dimension_numbers<[1], [1], [0], [0], [0, 0, 1, 0], [], []>} : vector<128x128xbf16>, vector<128x128xbf16>, vector<128x128xf32> -> vector<128x128xf32>
    %3 = tpu.iota {dimensions = array<i32: 1>} : vector<128x128xi32>
    %c128_i32 = arith.constant 128 : i32
    %4 = arith.muli %arg1, %c128_i32 : i32
    %5 = vector.broadcast %4 : i32 to vector<128x128xi32>
    %6 = arith.addi %3, %5 : vector<128x128xi32>
    %c32_i32 = arith.constant 32 : i32
    %7 = vector.broadcast %c32_i32 : i32 to vector<128x128xi32>
    %8 = arith.cmpi slt, %6, %7 : vector<128x128xi32>
    %cst_3 = arith.constant -1.000000e+30 : f32
    %9 = vector.broadcast %cst_3 : f32 to vector<128x128xf32>
    %10 = arith.select %8, %2, %9 : vector<128x128xi1>, vector<128x128xf32>
    %c0_4 = arith.constant 0 : index
    %c0_5 = arith.constant 0 : index
    %11 = vector.load %arg4[%c0_4, %c0_5] : memref<128x128xf32, #tpu.memory_space<vmem>>, vector<128x128xf32>
    tpu.vector_store %arg4[%c0_4, %c0_5], %10 {strides = array<i32>} : memref<128x128xf32, #tpu.memory_space<vmem>>, vector<128x128xf32>,
    return
  }
  func.func @transform_0(%arg0: i32, %arg1: i32) -> (i32, i32) {
    %c0_i32 = arith.constant 0 : i32
    %c0_i32_0 = arith.constant 0 : i32
    return %arg0, %c0_i32 : i32, i32
  }
  func.func @transform_1(%arg0: i32, %arg1: i32) -> (i32, i32) {
    %c0_i32 = arith.constant 0 : i32
    %c0_i32_0 = arith.constant 0 : i32
    return %arg1, %c0_i32 : i32, i32
  }
  func.func @transform_2(%arg0: i32, %arg1: i32) -> (i32, i32) {
    %c0_i32 = arith.constant 0 : i32
    return %arg0, %arg1 : i32, i32
  }
}

</mosaic_0001>

<bundles_post_ra>
// kernel: cosine_similarity_padded.1
= control target key start
LH: loop header
LB: loop body
LE: loop exit
PB: predicated region body
PF: predicated region fallthrough
CT: control target
= control target key end

     0   :  { %s509_s0 = inlined_call_operand.vmem [shape: bf16[128,128], index: 0, kind: input, shape index: {}, may-alias: {0,1}]   ;;  %s510_s1 = inlined_call_operand.vmem [shape: bf16[128,128], index: 1, kind: input, shape index: {}, may-alias: {0,1}]   ;;  %s511_s2 = inlined_call_operand.hbm [shape: f32[128,128], index: 2, kind: output, shape index: {}]  }
   0x1   :  { %v375_v0 = vld [vmem:[%s510_s1] sm:$0xff]   ;;  %v376_v1 = vld [vmem:[%s510_s1 + $0x8] sm:$0xff]   ;;  %v377_v2 = vld [vmem:[%s510_s1 + $0x10] sm:$0xff]  }
   0x2   :  { %324 = vmatprep.subr.bf16.mxu0 %v375_v0  ;;  %356 = vmatprep.subr.bf16.mxu1 %v375_v0  ;;  %v383_v3 = vld [vmem:[%s509_s0] sm:$0xff]   ;;  %v378_v5 = vld [vmem:[%s510_s1 + $0x18] sm:$0xff]  }
   0x3   :  { %325 = vmatpush3.bf16.xpose.msra.mxu0 %v375_v0  ;;  %364 = vmatpush3.bf16.xpose.msra.mxu1 %v375_v0  ;;  %v384_v4 = vld [vmem:[%s509_s0 + $0x20] sm:$0xff]  }
   0x4   :  { %326 = vmatprep.subr.bf16.mxu0 %v376_v1  ;;  %357 = vmatprep.subr.bf16.mxu1 %v376_v1 }
   0x5   :  { %340 = vmatprep.mubr.bf16.mxu0 %v383_v3  ;;  %348 = vmatprep.mubr.bf16.mxu1 %v384_v4 }
   0xb   :  { %327 = vmatpush3.bf16.xpose.msra.mxu0 %v376_v1  ;;  %365 = vmatpush3.bf16.xpose.msra.mxu1 %v376_v1 }
   0xc   :  { %328 = vmatprep.subr.bf16.mxu0 %v377_v2  ;;  %358 = vmatprep.subr.bf16.mxu1 %v377_v2 }
   0xd   :  { %7 = vsyncpa [#allocation3], 0  ;;  %v379_v6 = vld [vmem:[%s510_s1 + $0x20] sm:$0xff]   ;;  %v380_v7 = vld [vmem:[%s510_s1 + $0x28] sm:$0xff]   ;;  %v238_v16 = vlaneseq }
   0xe   :  { %v381_v8 = vld [vmem:[%s510_s1 + $0x30] sm:$0xff]   ;;  %v382_v9 = vld [vmem:[%s510_s1 + $0x38] sm:$0xff]   ;;  %v385_v10 = vld [vmem:[%s509_s0 + $0x8] sm:$0xff]  }
   0xf   :  { %v386_v11 = vld [vmem:[%s509_s0 + $0x28] sm:$0xff]   ;;  %v387_v12 = vld [vmem:[%s509_s0 + $0x10] sm:$0xff]   ;;  %v389_v14 = vld [vmem:[%s509_s0 + $0x18] sm:$0xff]   ;;  %v239_v17 = vand.u32 127, %v238_v16 }
  0x10   :  { %v388_v13 = vld [vmem:[%s509_s0 + $0x30] sm:$0xff]   ;;  %v390_v15 = vld [vmem:[%s509_s0 + $0x38] sm:$0xff]   ;;  %s415_s0 = smov [#allocation2]  }
  0x11   :  { %vm243_vm0 = vcmp.lt.s32.totalorder %v239_v17, 32  ;;  %s281_s12 = sshll.u32 %s415_s0, 4  ;;  %s282_s12 = int_to_ptr.vmem [resolvable:$true] %s281_s12 }
  0x12   :  { %s391_s13 = scalar_lea.vmem %s282_s12, 2048  ;;  %p396_p1 = scmp.lt.s32.totalorder %s282_s12, %s282_s12 }
  0x13   :  { %329 = vmatpush3.bf16.xpose.msra.mxu0 %v377_v2  ;;  %366 = vmatpush3.bf16.xpose.msra.mxu1 %v377_v2  ;;  %p392_p0 = scmp.ne.s32.totalorder %s282_s12, %s391_s13  ;;  %p397_p2 = scmp.lt.s32.totalorder %s391_s13, %s391_s13 }
  0x14   :  { %330 = vmatprep.subr.bf16.mxu0 %v378_v5  ;;  %359 = vmatprep.subr.bf16.mxu1 %v378_v5 }
  0x15   :  { %p398_p3 = por %p397_p2, %p396_p1 }
  0x17   :  { %p399_p4 = pnand %p398_p3, %p392_p0 }
  0x1b   :  { %331 = vmatpush3.bf16.xpose.msra.mxu0 %v378_v5  ;;  %367 = vmatpush3.bf16.xpose.msra.mxu1 %v378_v5 }
  0x1c   :  { %332 = vmatprep.subr.bf16.mxu0 %v379_v6  ;;  %360 = vmatprep.subr.bf16.mxu1 %v379_v6 }
  0x23   :  { %333 = vmatpush3.bf16.xpose.msra.mxu0 %v379_v6  ;;  %368 = vmatpush3.bf16.xpose.msra.mxu1 %v379_v6 }
  0x24   :  { %334 = vmatprep.subr.bf16.mxu0 %v380_v7  ;;  %361 = vmatprep.subr.bf16.mxu1 %v380_v7 }
  0x2b   :  { %335 = vmatpush3.bf16.xpose.msra.mxu0 %v380_v7  ;;  %369 = vmatpush3.bf16.xpose.msra.mxu1 %v380_v7 }
  0x2c   :  { %336 = vmatprep.subr.bf16.mxu0 %v381_v8  ;;  %362 = vmatprep.subr.bf16.mxu1 %v381_v8 }
  0x33   :  { %337 = vmatpush3.bf16.xpose.msra.mxu0 %v381_v8  ;;  %370 = vmatpush3.bf16.xpose.msra.mxu1 %v381_v8 }
  0x34   :  { %338 = vmatprep.subr.bf16.mxu0 %v382_v9  ;;  %363 = vmatprep.subr.bf16.mxu1 %v382_v9 }
  0x3b   :  { %339 = vmatpush3.bf16.xpose.msra.mxu0 %v382_v9  ;;  %371 = vmatpush3.bf16.xpose.msra.mxu1 %v382_v9 }
  0x42   :  { %341 = vmatmul.mubr.bf16.vlgmr.msra.gmra.mrb[0].mxu0 %v385_v10  ;;  %349 = vmatmul.mubr.bf16.vlgmr.msra.gmra.mrb[0].mxu1 %v386_v11 }
  0x43   :  { %344 = vmatprep.mubr.bf16.mxu0 %v387_v12  ;;  %352 = vmatprep.mubr.bf16.mxu1 %v388_v13 }
  0x4a   :  { %345 = vmatmul.mubr.bf16.gmra.mrb[4].mxu0 %v389_v14  ;;  %353 = vmatmul.mubr.bf16.gmra.mrb[4].mxu1 %v390_v15 }
 0x115   :  { %v342_v18 = vpop.f32.mrb[0].mxu0  ;;  %v350_v19 = vpop.f32.mrb[0].mxu1 }
 0x116   :  { %v246_v20 = vsel %vm243_vm0, %v342_v18, -1e+30  ;;  %v254_v21 = vsel %vm243_vm0, %v350_v19, -1e+30  ;;  %v175_v22 = vpop.f32.mrb[1].mxu0  ;;  %v207_v23 = vpop.f32.mrb[1].mxu1 }
 0x117   :  { %262 = vst [vmem:[#allocation2 + $0x10] sm:$0xff] %v246_v20  ;;  %270 = vst [vmem:[#allocation2 + $0x50] sm:$0xff] %v254_v21  ;;  %v244_v24 = vsel %vm243_vm0, %v175_v22, -1e+30  ;;  %v252_v25 = vsel %vm243_vm0, %v207_v23, -1e+30 }
 0x118   :  { %v343_v26 = vpop.f32.mrb[2].mxu0  ;;  %v351_v27 = vpop.f32.mrb[2].mxu1  ;;  %260 = vst [vmem:[#allocation2] sm:$0xff] %v244_v24  ;;  %268 = vst [vmem:[#allocation2 + $0x40] sm:$0xff] %v252_v25 }
 0x119   :  { %v247_v28 = vsel %vm243_vm0, %v343_v26, -1e+30  ;;  %v255_v29 = vsel %vm243_vm0, %v351_v27, -1e+30  ;;  %v178_v30 = vpop.f32.mrb[3].mxu0  ;;  %v210_v31 = vpop.f32.mrb[3].mxu1 }
 0x11a   :  { %263 = vst [vmem:[#allocation2 + $0x18] sm:$0xff] %v247_v28  ;;  %271 = vst [vmem:[#allocation2 + $0x58] sm:$0xff] %v255_v29  ;;  %v245_v32 = vsel %vm243_vm0, %v178_v30, -1e+30  ;;  %v253_v33 = vsel %vm243_vm0, %v210_v31, -1e+30 }
 0x11b   :  { %261 = vst [vmem:[#allocation2 + $0x8] sm:$0xff] %v245_v32  ;;  %269 = vst [vmem:[#allocation2 + $0x48] sm:$0xff] %v253_v33 }
 0x11d   :  { %v346_v34 = vpop.f32.mrb[4].mxu0  ;;  %v354_v35 = vpop.f32.mrb[4].mxu1 }
 0x11e   :  { %v250_v36 = vsel %vm243_vm0, %v346_v34, -1e+30  ;;  %v258_v37 = vsel %vm243_vm0, %v354_v35, -1e+30  ;;  %v191_v38 = vpop.f32.mrb[5].mxu0  ;;  %v223_v39 = vpop.f32.mrb[5].mxu1 }
 0x11f   :  { %266 = vst [vmem:[#allocation2 + $0x30] sm:$0xff] %v250_v36  ;;  %274 = vst [vmem:[#allocation2 + $0x70] sm:$0xff] %v258_v37  ;;  %v248_v40 = vsel %vm243_vm0, %v191_v38, -1e+30  ;;  %v256_v41 = vsel %vm243_vm0, %v223_v39, -1e+30 }
 0x120   :  { %v347_v42 = vpop.f32.mrb[6].mxu0  ;;  %v355_v43 = vpop.f32.mrb[6].mxu1  ;;  %264 = vst [vmem:[#allocation2 + $0x20] sm:$0xff] %v248_v40  ;;  %272 = vst [vmem:[#allocation2 + $0x60] sm:$0xff] %v256_v41 }
 0x121   :  { %v251_v44 = vsel %vm243_vm0, %v347_v42, -1e+30  ;;  %v259_v45 = vsel %vm243_vm0, %v355_v43, -1e+30  ;;  %v194_v46 = vpop.f32.mrb[7].mxu0  ;;  %v226_v47 = vpop.f32.mrb[7].mxu1 }
 0x122   :  { %267 = vst [vmem:[#allocation2 + $0x38] sm:$0xff] %v251_v44  ;;  %275 = vst [vmem:[#allocation2 + $0x78] sm:$0xff] %v259_v45  ;;  %v249_v48 = vsel %vm243_vm0, %v194_v46, -1e+30  ;;  %v257_v49 = vsel %vm243_vm0, %v226_v47, -1e+30 }
 0x123   :  { %265 = vst [vmem:[#allocation2 + $0x28] sm:$0xff] %v249_v48  ;;  %273 = vst [vmem:[#allocation2 + $0x68] sm:$0xff] %v257_v49 }
 0x124   :  { %402 = shalt.err (!%p399_p4)
}
 0x125   :  { %s403_s16 = scalar_lea.hbm %s511_s2, 2048 }
 0x126   :  { %p404_p5 = scmp.ne.s32.totalorder %s511_s2, %s403_s16  ;;  %p407_p6 = scmp.lt.u32.totalorder %s403_s16, %s511_s2 }
 0x128   :  { %p409_p7 = pnand %p407_p6, %p404_p5 }
 0x12a   :  { %412 = shalt.err (!%p409_p7)
}
 0x12b   :  { %s416_s21 = smov 128   ;;  %s417_s22 = smov 8  }
 0x12c   :  { %287 = dma.vmem_to_hbm [thread:$0]  %s282_s12, 2048, %s511_s2, [#allocation3], %s416_s21, %s416_s21, %s417_s22  }
 0x12d   :  { %413 = dma.done.wait [#allocation3], 2048  }
 0x12e   :  { %414 = vsyncadd [#allocation3], 4294965248 }
 0x12f   :  { %291 = vsyncpa [#allocation3], 1 }

</bundles_post_ra>
